<compile_context>
chip_gen: v7x
topology: tpu7x:2x2x1
jax: 0.10.0
libtpu: 0.0.40
codegen_flags: <defaults>
</compile_context>

<pallas_src>
import jax
import jax.numpy as jnp
from jax.experimental import pallas as pl
from jax.experimental.pallas import tpu as pltpu


def time_embedding_kernel(x_ref, w_ref, b_ref, o_ref):
    x = x_ref[...]
    xf = x.astype(jnp.float32)
    # SiLU in f32 for numerics, then back to the input dtype so the MXU runs its
    # native (e.g. bf16) path with f32 accumulation.
    h = (xf * jax.nn.sigmoid(xf)).astype(x.dtype)
    acc = jnp.dot(h, w_ref[...], preferred_element_type=jnp.float32)
    acc = acc + b_ref[...].astype(jnp.float32)      # (1, tile_n) broadcasts over rows
    o_ref[...] = acc.astype(o_ref.dtype)


def _divisors_desc(n, cap=None):
    cap = n if cap is None else min(cap, n)
    return [d for d in range(cap, 0, -1) if n % d == 0]


def _vmem_capacity_bytes():
    try:
        info = pltpu.get_tpu_info()
        cap = getattr(info, "vmem_capacity_bytes", None)
        if cap:
            return int(cap)
    except Exception:
        pass
    return 64 * 1024 * 1024          # v7x-safe fallback (smallest of v5e/v6e/v7x)


def _footprint_bytes(tb, tn, nb, nn, D, x_it, w_it, b_it, o_it):
    """VMEM bytes for the pipelined tiles (single-buffer grid-invariant inputs)."""
    grid_steps = nb * nn
    x_bufs = 1 if grid_steps == 1 else 2
    w_bufs = 1 if nn == 1 else 2
    b_bufs = 1 if nn == 1 else 2
    o_bufs = 2                              # output writeback stays double-buffered
    return (x_bufs * tb * D * x_it
            + w_bufs * D * tn * w_it
            + b_bufs * 8 * tn * b_it        # (1, tn) pads to 8 sublanes in VMEM
            + o_bufs * tb * tn * o_it)


def _select_tiles(B, D, N, x_dt, w_dt, b_dt, o_dt, budget):
    x_it, w_it, b_it, o_it = (jnp.dtype(d).itemsize for d in (x_dt, w_dt, b_dt, o_dt))

    # B tile candidates: divisors of B, preferring sublane-packed multiples.
    b_mult = 16 if x_it == 2 else 8
    b_cands = [t for t in _divisors_desc(B, 1024) if t == B or t % b_mult == 0]
    if not b_cands:
        b_cands = _divisors_desc(B, 1024)

    # Preferred: full N in a single block; pick the largest B tile that fits.
    for tb in b_cands:
        if _footprint_bytes(tb, N, B // tb, 1, D, x_it, w_it, b_it, o_it) <= budget:
            return tb, N

    # Rare fallback: tile N too (lane-dense multiples of 128, largest first).
    tb = next((t for t in b_cands if t <= 256), b_cands[-1])
    nb = B // tb
    n_cands = [t for t in _divisors_desc(N) if t % 128 == 0] or [N]
    for tn in n_cands:
        if _footprint_bytes(tb, tn, nb, N // tn, D, x_it, w_it, b_it, o_it) <= budget:
            return tb, tn
    return tb, n_cands[-1]                  # last resort; let the compiler try


def time_embedding(x, w_t, b, *, tile_b=None, tile_n=None):
    """x: (B, t_emb_dim); w_t: (t_emb_dim, n_out); b: (n_out,) or (1, n_out) -> (B, n_out)."""
    B, D = x.shape
    D2, N = w_t.shape
    assert D2 == D
    b2 = b.reshape(1, N)

    vmem_cap = _vmem_capacity_bytes()
    budget = int(0.75 * vmem_cap)

    auto_tb, auto_tn = _select_tiles(B, D, N, x.dtype, w_t.dtype, b2.dtype, x.dtype,
                                     budget)
    tile_b = auto_tb if tile_b is None else tile_b
    tile_n = auto_tn if tile_n is None else tile_n
    assert B % tile_b == 0 and N % tile_n == 0
    nb, nn = B // tile_b, N // tile_n

    # Grid ordered (N outer, B inner) so the dominant operand W is streamed from
    # HBM at most once even when B needs tiling; only the small x tile is re-read.
    grid = (nn, nb)
    single_step = (nn == 1 and nb == 1)

    x_spec = pl.BlockSpec((tile_b, D), lambda j, i: (i, 0),
                          pipeline_mode=pl.Buffered(1) if single_step else None)
    w_spec = pl.BlockSpec((D, tile_n), lambda j, i: (0, j),
                          pipeline_mode=pl.Buffered(1) if nn == 1 else None)
    b_spec = pl.BlockSpec((1, tile_n), lambda j, i: (0, j),
                          pipeline_mode=pl.Buffered(1) if nn == 1 else None)
    o_spec = pl.BlockSpec((tile_b, tile_n), lambda j, i: (i, j))

    working = _footprint_bytes(tile_b, tile_n, nb, nn, D,
                               x.dtype.itemsize, w_t.dtype.itemsize,
                               b2.dtype.itemsize, x.dtype.itemsize)
    vmem_limit = int(min(max(2 * working, 32 * 1024 * 1024), int(0.9 * vmem_cap)))

    return pl.pallas_call(
        time_embedding_kernel,
        out_shape=jax.ShapeDtypeStruct((B, N), x.dtype),
        grid_spec=pltpu.PrefetchScalarGridSpec(
            num_scalar_prefetch=0,
            grid=grid,
            in_specs=[x_spec, w_spec, b_spec],
            out_specs=o_spec,
        ),
        compiler_params=pltpu.CompilerParams(
            dimension_semantics=("parallel", "parallel"),
            vmem_limit_bytes=vmem_limit,
        ),
    )(x, w_t, b2)


def reference(x, w_t, b):
    xf = x.astype(jnp.float32)
    h = xf * jax.nn.sigmoid(xf)
    return h @ w_t.astype(jnp.float32) + b.astype(jnp.float32)


if __name__ == "__main__":
    key = jax.random.PRNGKey(0)
    B, T_EMB, N_OUT = 8, 128, 256   # t_emb_dim=128 matches the module default

    kx, kw, kb = jax.random.split(key, 3)
    x = jax.random.normal(kx, (B, T_EMB), dtype=jnp.float32)
    # Deterministic "PyTorch-like" Linear init (uniform in +/- 1/sqrt(fan_in)).
    bound = 1.0 / jnp.sqrt(jnp.float32(T_EMB))
    # PyTorch weight is (n_out, t_emb_dim); store pre-transposed for the kernel.
    w = jax.random.uniform(kw, (N_OUT, T_EMB), minval=-bound, maxval=bound,
                           dtype=jnp.float32)
    b = jax.random.uniform(kb, (N_OUT,), minval=-bound, maxval=bound,
                           dtype=jnp.float32)
    w_t = w.T                      # (t_emb_dim, n_out)

    ref = reference(x, w_t, b.reshape(1, N_OUT))

    # f32 path
    out = jax.block_until_ready(time_embedding(x, w_t, b))
    assert out.shape == (B, N_OUT)
    assert jnp.allclose(out, ref, atol=1e-4, rtol=1e-4)

    # bf16 path: operands reach the MXU as bf16 with f32 accumulation.
    xb = x.astype(jnp.bfloat16)
    wb = w_t.astype(jnp.bfloat16)
    bb = b.astype(jnp.bfloat16)
    out_bf16 = jax.block_until_ready(time_embedding(xb, wb, bb))
    assert out_bf16.dtype == jnp.bfloat16
    assert jnp.allclose(out_bf16.astype(jnp.float32), ref, atol=1e-1, rtol=1e-1)

    print("KERNEL_OK")
</pallas_src>

<mosaic_0001>
module attributes {stable_mosaic.version = 11 : i64} {
  func.func @time_embedding_kernel(%arg0: i32, %arg1: i32, %arg2: memref<8x128xf32, #tpu.memory_space<vmem>>, %arg3: memref<128x256xf32, #tpu.memory_space<vmem>>, %arg4: memref<1x256xf32, #tpu.memory_space<vmem>>, %arg5: memref<8x256xf32, #tpu.memory_space<vmem>>) attributes {dimension_semantics = [#tpu.dimension_semantics<parallel>, #tpu.dimension_semantics<parallel>], iteration_bounds = array<i64: 1, 1>, scalar_prefetch = 0 : i64, scratch_operands = 0 : i64, tpu.core_type = #tpu.core_type<tc>, window_params = [{pipeline_mode = #tpu.pipeline_mode<synchronous>, transform_indices = @transform_0, window_bounds = array<i64: 8, 128>}, {pipeline_mode = #tpu.pipeline_mode<synchronous>, transform_indices = @transform_1, window_bounds = array<i64: 128, 256>}, {pipeline_mode = #tpu.pipeline_mode<synchronous>, transform_indices = @transform_2, window_bounds = array<i64: 1, 256>}, {transform_indices = @transform_3, window_bounds = array<i64: 8, 256>}]} {
    %c0 = arith.constant 0 : index
    %c0_0 = arith.constant 0 : index
    %0 = vector.load %arg2[%c0, %c0_0] : memref<8x128xf32, #tpu.memory_space<vmem>>, vector<8x128xf32>
    %1 = arith.negf %0 : vector<8x128xf32>
    %2 = math.exp %1 : vector<8x128xf32>
    %cst = arith.constant 1.000000e+00 : f32
    %3 = vector.broadcast %cst : f32 to vector<8x128xf32>
    %4 = arith.addf %3, %2 : vector<8x128xf32>
    %5 = arith.divf %3, %4 : vector<8x128xf32>
    %6 = arith.mulf %0, %5 : vector<8x128xf32>
    %c0_1 = arith.constant 0 : index
    %c0_2 = arith.constant 0 : index
    %7 = vector.load %arg3[%c0_1, %c0_2] : memref<128x256xf32, #tpu.memory_space<vmem>>, vector<128x256xf32>
    %cst_3 = arith.constant dense<0.000000e+00> : vector<8x256xf32>
    %8 = tpu.matmul %6, %7, %cst_3 {dimension_numbers = #tpu.dot_dimension_numbers<[1], [0], [0], [1], [0, 0, 1, 1], [], []>} : vector<8x128xf32>, vector<128x256xf32>, vector<8x256xf32> -> vector<8x256xf32>
    %c0_4 = arith.constant 0 : index
    %c0_5 = arith.constant 0 : index
    %9 = vector.load %arg4[%c0_4, %c0_5] : memref<1x256xf32, #tpu.memory_space<vmem>>, vector<1x256xf32>
    %10 = vector.broadcast %9 : vector<1x256xf32> to vector<8x256xf32>
    %11 = arith.addf %8, %10 : vector<8x256xf32>
    %c0_6 = arith.constant 0 : index
    %c0_7 = arith.constant 0 : index
    %12 = vector.load %arg5[%c0_6, %c0_7] : memref<8x256xf32, #tpu.memory_space<vmem>>, vector<8x256xf32>
    tpu.vector_store %arg5[%c0_6, %c0_7], %11 {strides = array<i32>} : memref<8x256xf32, #tpu.memory_space<vmem>>, vector<8x256xf32>,
    return
  }
  func.func @transform_0(%arg0: i32, %arg1: i32) -> (i32, i32) {
    %c0_i32 = arith.constant 0 : i32
    %c0_i32_0 = arith.constant 0 : i32
    return %arg1, %c0_i32 : i32, i32
  }
  func.func @transform_1(%arg0: i32, %arg1: i32) -> (i32, i32) {
    %c0_i32 = arith.constant 0 : i32
    %c0_i32_0 = arith.constant 0 : i32
    return %c0_i32, %arg0 : i32, i32
  }
  func.func @transform_2(%arg0: i32, %arg1: i32) -> (i32, i32) {
    %c0_i32 = arith.constant 0 : i32
    %c0_i32_0 = arith.constant 0 : i32
    return %c0_i32, %arg0 : i32, i32
  }
  func.func @transform_3(%arg0: i32, %arg1: i32) -> (i32, i32) {
    %c0_i32 = arith.constant 0 : i32
    return %arg1, %arg0 : i32, i32
  }
}

</mosaic_0001>

<bundles_post_ra>
// kernel: tpu_custom_call.1
= control target key start
LH: loop header
LB: loop body
LE: loop exit
PB: predicated region body
PF: predicated region fallthrough
CT: control target
= control target key end

     0   :  { %8 = vsyncpa [#allocation3], 0  ;;  %s369_s0 = inlined_call_operand.hbm [shape: f32[8,128], index: 0, kind: input, shape index: {}]   ;;  %s370_s1 = inlined_call_operand.hbm [shape: f32[128,256], index: 1, kind: input, shape index: {}]   ;;  %s371_s2 = inlined_call_operand.vmem [shape: f32[1,256], index: 2, kind: input, shape index: {}]   ;;  %s372_s3 = inlined_call_operand.hbm [shape: f32[8,256], index: 3, kind: output, shape index: {}]  }
   0x1   :  { %9 = vsyncpa [#allocation6], 0 }
   0x2   :  { %10 = vsyncpa [#allocation4], 0  ;;  %s297_s12 = smov [#allocation2]   ;;  %s298_s14 = smov [#allocation5]  }
   0x3   :  { %s17_s13 = sshll.u32 %s297_s12, 4  ;;  %s26_s15 = sshll.u32 %s298_s14, 4  ;;  %s18_s13 = int_to_ptr.vmem [resolvable:$true] %s17_s13  ;;  %s323_s15 = int_to_ptr.vmem [resolvable:$true] %s26_s15 }
   0x4   :  { %s225_s18 = scalar_lea.hbm %s369_s0, 128 }
   0x5   :  { %p226_p0 = scmp.ne.s32.totalorder %s369_s0, %s225_s18  ;;  %p229_p1 = scmp.lt.u32.totalorder %s225_s18, %s369_s0 }
   0x7   :  { %p231_p2 = pnand %p229_p1, %p226_p0 }
   0x9   :  { %234 = shalt.err (!%p231_p2)
}
   0xa   :  { %s235_s23 = scalar_lea.vmem %s18_s13, 128  ;;  %p240_p4 = scmp.lt.s32.totalorder %s18_s13, %s18_s13 }
   0xb   :  { %p236_p3 = scmp.ne.s32.totalorder %s18_s13, %s235_s23  ;;  %p241_p5 = scmp.lt.s32.totalorder %s235_s23, %s235_s23 }
   0xd   :  { %p242_p6 = por %p241_p5, %p240_p4 }
   0xf   :  { %p243_p7 = pnand %p242_p6, %p236_p3 }
  0x11   :  { %246 = shalt.err (!%p243_p7)
}
  0x12   :  { %20 = dma.hbm_to_vmem [thread:$0]  %s369_s0, 128, %s18_s13, [#allocation3]  }
  0x13   :  { %s247_s28 = scalar_lea.hbm %s370_s1, 4096 }
  0x14   :  { %p248_p8 = scmp.ne.s32.totalorder %s370_s1, %s247_s28  ;;  %p251_p9 = scmp.lt.u32.totalorder %s247_s28, %s370_s1 }
  0x16   :  { %p253_p10 = pnand %p251_p9, %p248_p8 }
  0x18   :  { %256 = shalt.err (!%p253_p10)
}
  0x19   :  { %s257_s6 = scalar_lea.vmem %s323_s15, 4096  ;;  %p262_p12 = scmp.lt.s32.totalorder %s323_s15, %s323_s15 }
  0x1a   :  { %p258_p11 = scmp.ne.s32.totalorder %s323_s15, %s257_s6  ;;  %p263_p13 = scmp.lt.s32.totalorder %s257_s6, %s257_s6 }
  0x1c   :  { %p264_p0 = por %p263_p13, %p262_p12 }
  0x1e   :  { %p265_p1 = pnand %p264_p0, %p258_p11 }
  0x20   :  { %268 = shalt.err (!%p265_p1)
}
  0x21   :  { %s299_s0 = smov 256   ;;  %s300_s7 = smov 16  }
  0x22   :  { %32 = dma.hbm_to_vmem [thread:$0]  %s370_s1, 4096, %s323_s15, [#allocation6], %s299_s0, %s299_s0, %s300_s7  }
  0x23   :  { %291 = dma.done.wait [#allocation3], 128  }
  0x24   :  { %292 = vsyncadd [#allocation3], 4294967168 }
  0x25   :  { %293 = dma.done.wait [#allocation6], 4096  }
  0x26   :  { %294 = vsyncadd [#allocation6], 4294963200  ;;  %v301_v0 = vmov 0.0   ;;  %v50_v1 = vld [vmem:[#allocation5 + $0x8] sm:$0xff]  ;;  %v52_v2 = vld [vmem:[#allocation5 + $0x18] sm:$0xff]  ;;  %v83_v55 = vlaneseq  ;;  %s302_s11 = smov [#allocation7]  }
  0x27   :  { %157 = vmatprep.mubr.f32.mxu0 %v301_v0  ;;  %v49_v3 = vld [vmem:[#allocation5] sm:$0xff]  ;;  %v183_v4 = vpack.c.bf16 %v52_v2, %v50_v1  ;;  %v51_v5 = vld [vmem:[#allocation5 + $0x10] sm:$0xff]  ;;  %v54_v6 = vld [vmem:[#allocation5 + $0x28] sm:$0xff]  ;;  %s172_s12 = sshll.u32 %s302_s11, 4  ;;  %s173_s12 = int_to_ptr.vmem [resolvable:$true] %s172_s12 }
  0x28   :  { %v56_v7 = vld [vmem:[#allocation5 + $0x38] sm:$0xff]  ;;  %v185_v8 = vpack.c.bf16 %v51_v5, %v49_v3  ;;  %v53_v10 = vld [vmem:[#allocation5 + $0x20] sm:$0xff]  ;;  %v55_v11 = vld [vmem:[#allocation5 + $0x30] sm:$0xff]  ;;  %v84_v56 = vshrl.u32 %v83_v55, 7  ;;  %s269_s13 = scalar_lea.vmem %s173_s12, 256  ;;  %p274_p3 = scmp.lt.s32.totalorder %s173_s12, %s173_s12 }
  0x29   :  { %v187_v9 = vpack.c.bf16 %v56_v7, %v54_v6  ;;  %v58_v12 = vld [vmem:[#allocation5 + $0x48] sm:$0xff]  ;;  %184 = vmatprep.subr.bf16.mxu0 %v183_v4  ;;  %v60_v13 = vld [vmem:[#allocation5 + $0x58] sm:$0xff]  ;;  %v189_v14 = vpack.c.bf16 %v55_v11, %v53_v10  ;;  %v57_v16 = vld [vmem:[#allocation5 + $0x40] sm:$0xff]  ;;  %p270_p2 = scmp.ne.s32.totalorder %s173_s12, %s269_s13  ;;  %p275_p4 = scmp.lt.s32.totalorder %s269_s13, %s269_s13 }
  0x2a   :  { %186 = vmatpush1.bf16.msra.mxu0 %v185_v8  ;;  %v191_v15 = vpack.c.bf16 %v60_v13, %v58_v12  ;;  %v59_v17 = vld [vmem:[#allocation5 + $0x50] sm:$0xff]  ;;  %v62_v18 = vld [vmem:[#allocation5 + $0x68] sm:$0xff]  ;;  %v64_v19 = vld [vmem:[#allocation5 + $0x78] sm:$0xff]  ;;  %v85_v57 = vsub.s32 0, %v84_v56  ;;  %v89_v59 = vsub.s32 1, %v84_v56 }
  0x2b   :  { %188 = vmatprep.subr.bf16.mxu0 %v187_v9  ;;  %v193_v20 = vpack.c.bf16 %v59_v17, %v57_v16  ;;  %v195_v21 = vpack.c.bf16 %v64_v19, %v62_v18  ;;  %v61_v22 = vld [vmem:[#allocation5 + $0x60] sm:$0xff]  ;;  %v63_v23 = vld [vmem:[#allocation5 + $0x70] sm:$0xff]  ;;  %v66_v24 = vld [vmem:[#allocation5 + $0x88] sm:$0xff]  ;;  %p276_p5 = por %p275_p4, %p274_p3 }
  0x2c   :  { %v68_v25 = vld [vmem:[#allocation5 + $0x98] sm:$0xff]  ;;  %v197_v28 = vpack.c.bf16 %v63_v23, %v61_v22  ;;  %v65_v30 = vld [vmem:[#allocation5 + $0x80] sm:$0xff]  ;;  %v67_v31 = vld [vmem:[#allocation5 + $0x90] sm:$0xff] }
  0x2d   :  { %v41_v26 = vld [vmem:[#allocation2] sm:$0xff]  ;;  %v199_v29 = vpack.c.bf16 %v68_v25, %v66_v24  ;;  %v70_v32 = vld [vmem:[#allocation5 + $0xa8] sm:$0xff]  ;;  %v201_v34 = vpack.c.bf16 %v67_v31, %v65_v30  ;;  %v69_v36 = vld [vmem:[#allocation5 + $0xa0] sm:$0xff]  ;;  %p277_p6 = pnand %p276_p5, %p270_p2 }
  0x2e   :  { %190 = vmatpush1.bf16.msra.mxu0 %v189_v14  ;;  %v182_v27 = vmul.f32 -1.442695, %v41_v26  ;;  %v72_v33 = vld [vmem:[#allocation5 + $0xb8] sm:$0xff]  ;;  %v71_v37 = vld [vmem:[#allocation5 + $0xb0] sm:$0xff]  ;;  %v74_v38 = vld [vmem:[#allocation5 + $0xc8] sm:$0xff] }
  0x2f   :  { %192 = vmatprep.subr.bf16.mxu0 %v191_v15  ;;  %v203_v35 = vpack.c.bf16 %v72_v33, %v70_v32  ;;  %v76_v39 = vld [vmem:[#allocation5 + $0xd8] sm:$0xff]  ;;  %v205_v40 = vpack.c.bf16 %v71_v37, %v69_v36  ;;  %v73_v42 = vld [vmem:[#allocation5 + $0xc0] sm:$0xff]  ;;  %v75_v43 = vld [vmem:[#allocation5 + $0xd0] sm:$0xff] }
  0x30   :  { %221 = vpow2.f32 %v182_v27  ;;  %v207_v41 = vpack.c.bf16 %v76_v39, %v74_v38  ;;  %v78_v44 = vld [vmem:[#allocation5 + $0xe8] sm:$0xff]  ;;  %v80_v45 = vld [vmem:[#allocation5 + $0xf8] sm:$0xff]  ;;  %v209_v47 = vpack.c.bf16 %v75_v43, %v73_v42  ;;  %v77_v50 = vld [vmem:[#allocation5 + $0xe0] sm:$0xff] }
  0x31   :  { %v211_v49 = vpack.c.bf16 %v80_v45, %v78_v44  ;;  %v79_v51 = vld [vmem:[#allocation5 + $0xf0] sm:$0xff]  ;;  %v81_v58 = vld [vmem:[%s371_s2] sm:$0x3] }
  0x32   :  { %194 = vmatpush1.bf16.msra.mxu0 %v193_v20  ;;  %v213_v52 = vpack.c.bf16 %v79_v51, %v77_v50  ;;  %v86_v60 = vrot.slane %v81_v58, %v85_v57  ;;  %v90_v61 = vrot.slane %v81_v58, %v89_v59 }
  0x33   :  { %196 = vmatprep.subr.bf16.mxu0 %v195_v21 }
  0x36   :  { %198 = vmatpush1.bf16.msra.mxu0 %v197_v28 }
  0x37   :  { %200 = vmatprep.subr.bf16.mxu0 %v199_v29 }
  0x3a   :  { %202 = vmatpush1.bf16.msra.mxu0 %v201_v34  ;;  %v222_v46 = vpop.eup %221 }
  0x3b   :  { %204 = vmatprep.subr.bf16.mxu0 %v203_v35  ;;  %v45_v48 = vadd.f32 1.0, %v222_v46 }
  0x3d   :  { %223 = vrcp.f32 %v45_v48 }
  0x3e   :  { %206 = vmatpush1.bf16.msra.mxu0 %v205_v40 }
  0x3f   :  { %208 = vmatprep.subr.bf16.mxu0 %v207_v41 }
  0x42   :  { %210 = vmatpush1.bf16.msra.mxu0 %v209_v47 }
  0x43   :  { %212 = vmatprep.subr.bf16.mxu0 %v211_v49 }
  0x46   :  { %214 = vmatpush1.bf16.msra.mxu0 %v213_v52 }
  0x47   :  { %v224_v53 = vpop.eup %223 }
  0x48   :  { %v48_v54 = vmul.f32 %v224_v53, %v41_v26 }
  0x4a   :  { %158 = vmatmul.mubr.f32.vlgmr.msra.gmra.mrb[0].mxu0 %v48_v54 }
 0x11d   :  { %v159_v62 = vpop.f32.mrb[0].mxu0 }
 0x11e   :  { %v160_v63 = vadd.f32 %v159_v62, %v86_v60  ;;  %v161_v0 = vpop.f32.mrb[1].mxu0 }
 0x11f   :  { %v162_v1 = vadd.f32 %v161_v0, %v90_v61 }
 0x120   :  { %164 = vst [vmem:[#allocation7] sm:$0xff] %v160_v63 }
 0x121   :  { %165 = vst [vmem:[#allocation7 + $0x8] sm:$0xff] %v162_v1 }
 0x122   :  { %280 = shalt.err (!%p277_p6)
}
 0x123   :  { %s281_s15 = scalar_lea.hbm %s372_s3, 256 }
 0x124   :  { %p282_p7 = scmp.ne.s32.totalorder %s372_s3, %s281_s15  ;;  %p285_p8 = scmp.lt.u32.totalorder %s281_s15, %s372_s3 }
 0x126   :  { %p287_p9 = pnand %p285_p8, %p282_p7 }
 0x128   :  { %290 = shalt.err (!%p287_p9)
}
 0x129   :  { %175 = dma.vmem_to_hbm [thread:$0]  %s173_s12, 256, %s372_s3, [#allocation4]  }
 0x12a   :  { %295 = dma.done.wait [#allocation4], 256  }
 0x12b   :  { %296 = vsyncadd [#allocation4], 4294967040 }
 0x12c   :  { %179 = vsyncpa [#allocation3], 1 }
 0x12d   :  { %180 = vsyncpa [#allocation6], 1 }
 0x12e   :  { %181 = vsyncpa [#allocation4], 1 }

</bundles_post_ra>
